<compile_context>
chip_gen: v7x
topology: tpu7x:2x2x1
jax: 0.10.0
libtpu: 0.0.40
codegen_flags: <defaults>
</compile_context>

<pallas_src>
import functools

import jax
import jax.numpy as jnp
from jax import lax
from jax.experimental import pallas as pl
from jax.experimental.pallas import tpu as pltpu


def _siglip_kernel(scale_ref, bias_ref, img_ref, txt_ref, out_ref, acc_ref, *, tm, tn):
    i = pl.program_id(0)
    j = pl.program_id(1)

    @pl.when(j == 0)
    def _():
        acc_ref[...] = jnp.zeros_like(acc_ref)

    # Fold the off-diagonal label (-1) into the affine scalars: the common
    # (off-diagonal) path then needs no extra full-tile negate.
    neg_scale = -scale_ref[0]
    neg_bias = -bias_ref[0]

    # (tm, tn) logits tile on the MXU: contract the feature dim of both operands
    # directly (no materialized transpose of the text tile), accumulate in f32.
    logits = lax.dot_general(
        img_ref[...],
        txt_ref[...],
        dimension_numbers=(((1,), (1,)), ((), ())),
        preferred_element_type=jnp.float32,
    )

    row_lo = i * tm
    col_lo = j * tn
    on_diag = (row_lo < col_lo + tn) & (col_lo < row_lo + tm)

    def _off_diag_tile(lg):
        # all labels are -1:  z = -(scale*lg + bias) = neg_scale*lg + neg_bias
        return neg_scale * lg + neg_bias

    def _diag_tile(lg):
        z_neg = neg_scale * lg + neg_bias
        r = row_lo + lax.broadcasted_iota(jnp.int32, (tm, tn), 0)
        c = col_lo + lax.broadcasted_iota(jnp.int32, (tm, tn), 1)
        # label is +1 on the global diagonal -> flip the sign back there.
        return jnp.where(r == c, -z_neg, z_neg)

    z = lax.cond(on_diag, _diag_tile, _off_diag_tile, logits)

    # numerically-stable logsigmoid(z) = min(z, 0) - log1p(exp(-|z|))
    logsig = jnp.minimum(z, 0.0) - jnp.log1p(jnp.exp(-jnp.abs(z)))

    # Reduce (tm, tn) -> (8, tn) with a balanced tree of sublane-group adds
    # (pure VPU, tile-aligned static slices, no cross-lane XLU work), then a
    # tiny 2-vreg accumulator read-modify-write.
    parts = [logsig[g * 8:(g + 1) * 8, :] for g in range(tm // 8)]
    while len(parts) > 1:
        nxt = [parts[a] + parts[a + 1] for a in range(0, len(parts) - 1, 2)]
        if len(parts) % 2:
            nxt.append(parts[-1])
        parts = nxt
    acc_ref[...] += parts[0]

    # Once per row block: write the lane-dense (8, tn) partial-sum block.  The
    # final tiny sum and the /M happen outside the kernel.
    @pl.when(j == pl.num_programs(1) - 1)
    def _():
        out_ref[...] = acc_ref[...]


def siglip_loss(image_features, text_features, logit_scale, logit_bias, *,
                tm=1024, tn=256, matmul_dtype=jnp.bfloat16):
    """Pallas SigLIP loss.  image_features: [M, D], text_features: [N, D]."""
    M, D = image_features.shape
    N, Dt = text_features.shape
    assert D == Dt
    # The reference applies an (M, M) label matrix to (M, N) logits; require square.
    assert M == N, "SigLipLoss (world_size=1) requires matching image/text batch sizes"

    tm = min(tm, M)
    tn = min(tn, N)
    assert M % tm == 0 and N % tn == 0, "batch must be divisible by the tile size"
    assert tm % 8 == 0, "row tile must be a multiple of the 8-row sublane group"

    num_i = M // tm
    num_j = N // tn

    # Cast matmul inputs to bf16 (f32 MXU accumulation, all loss math in f32):
    # halves the re-streamed text bytes and uses the fast MXU path everywhere.
    if matmul_dtype is not None and image_features.dtype != matmul_dtype:
        img = image_features.astype(matmul_dtype)
        txt = text_features.astype(matmul_dtype)
    else:
        img = image_features
        txt = text_features

    scale = jnp.asarray(logit_scale, jnp.float32).reshape((1,))
    bias = jnp.asarray(logit_bias, jnp.float32).reshape((1,))

    kernel = functools.partial(_siglip_kernel, tm=tm, tn=tn)

    # VMEM budget: double-buffered feature blocks + f32 logits/logsig tile +
    # (8, tn) accumulator/output.  Only override the scoped limit when the
    # estimate could exceed the most conservative (v5e: 16 MiB) default; cap at
    # v7x's 64 MiB physical VMEM.
    feat_bytes = jnp.dtype(img.dtype).itemsize
    vmem_est = (2 * tm * D + 2 * tn * D) * feat_bytes + tm * tn * 4 + 4 * 8 * tn * 4
    compiler_kwargs = dict(dimension_semantics=("parallel", "arbitrary"))
    if 2 * vmem_est > (16 << 20):
        compiler_kwargs["vmem_limit_bytes"] = min(2 * vmem_est, 64 << 20)

    partials = pl.pallas_call(
        kernel,
        out_shape=jax.ShapeDtypeStruct((num_i * 8, tn), jnp.float32),
        grid_spec=pltpu.PrefetchScalarGridSpec(
            num_scalar_prefetch=0,
            grid=(num_i, num_j),
            in_specs=[
                pl.BlockSpec(memory_space=pltpu.SMEM),       # logit_scale
                pl.BlockSpec(memory_space=pltpu.SMEM),       # logit_bias
                pl.BlockSpec((tm, D), lambda i, j: (i, 0)),  # image row-block (held across j sweep)
                pl.BlockSpec((tn, D), lambda i, j: (j, 0)),  # text col-block (streams each step)
            ],
            out_specs=pl.BlockSpec((8, tn), lambda i, j: (i, 0)),
            scratch_shapes=[pltpu.VMEM((8, tn), jnp.float32)],
        ),
        compiler_params=pltpu.CompilerParams(**compiler_kwargs),
    )(scale, bias, img, txt)

    return -jnp.sum(partials) / jnp.float32(M)


def siglip_loss_ref(image_features, text_features, logit_scale, logit_bias, *,
                    matmul_dtype=None):
    """Pure-JAX reference mirroring the PyTorch module (world_size == 1)."""
    imf = image_features if matmul_dtype is None else image_features.astype(matmul_dtype)
    txf = text_features if matmul_dtype is None else text_features.astype(matmul_dtype)
    logits = jnp.dot(imf, txf.T, preferred_element_type=jnp.float32)
    logits = jnp.float32(logit_scale) * logits + jnp.float32(logit_bias)
    n = image_features.shape[0]
    labels = 2.0 * jnp.eye(n, dtype=jnp.float32) - 1.0
    return -jnp.sum(jax.nn.log_sigmoid(labels * logits)) / n


if __name__ == "__main__":
    key = jax.random.PRNGKey(0)
    k1, k2 = jax.random.split(key)

    M, D = 16, 32  # small demo shapes (batch, embedding dim)
    image_features = jax.random.normal(k1, (M, D), dtype=jnp.float32)
    text_features = jax.random.normal(k2, (M, D), dtype=jnp.float32)
    # SigLIP-style defaults: scale = exp(log 10) = 10, bias = -10
    logit_scale = jnp.float32(10.0)
    logit_bias = jnp.float32(-10.0)

    loss = siglip_loss(image_features, text_features, logit_scale, logit_bias)
    loss = jax.block_until_ready(loss)

    # Reference with the same bf16 matmul inputs / f32 accumulation as the kernel.
    ref = siglip_loss_ref(image_features, text_features, logit_scale, logit_bias,
                          matmul_dtype=jnp.bfloat16)
    assert jnp.allclose(loss, ref, rtol=1e-4, atol=1e-4), (loss, ref)

    print("KERNEL_OK")
</pallas_src>

<mosaic_0001>
module attributes {stable_mosaic.version = 11 : i64} {
  func.func @_siglip_kernel(%arg0: i32, %arg1: i32, %arg2: memref<1xf32, #tpu.memory_space<smem>>, %arg3: memref<1xf32, #tpu.memory_space<smem>>, %arg4: memref<16x32xbf16, #tpu.memory_space<vmem>>, %arg5: memref<16x32xbf16, #tpu.memory_space<vmem>>, %arg6: memref<8x16xf32, #tpu.memory_space<vmem>>, %arg7: memref<8x16xf32, #tpu.memory_space<vmem>>) attributes {dimension_semantics = [#tpu.dimension_semantics<parallel>, #tpu.dimension_semantics<arbitrary>], iteration_bounds = array<i64: 1, 1>, scalar_prefetch = 0 : i64, scratch_operands = 1 : i64, tpu.core_type = #tpu.core_type<tc>, window_params = [{transform_indices = @transform_0, window_bounds = array<i64: 1>}, {transform_indices = @transform_1, window_bounds = array<i64: 1>}, {transform_indices = @transform_2, window_bounds = array<i64: 16, 32>}, {transform_indices = @transform_3, window_bounds = array<i64: 16, 32>}, {transform_indices = @transform_4, window_bounds = array<i64: 8, 16>}]} {
    %c0_i32 = arith.constant 0 : i32
    %0 = arith.cmpi eq, %arg1, %c0_i32 : i32
    %1 = arith.extui %0 : i1 to i32
    %c0_i32_0 = arith.constant 0 : i32
    %2 = arith.cmpi ne, %1, %c0_i32_0 : i32
    scf.if %2 {
      %cst_20 = arith.constant 0.000000e+00 : f32
      %37 = vector.broadcast %cst_20 : f32 to vector<8x16xf32>
      %c0_21 = arith.constant 0 : index
      %c0_22 = arith.constant 0 : index
      %38 = vector.load %arg7[%c0_21, %c0_22] : memref<8x16xf32, #tpu.memory_space<vmem>>, vector<8x16xf32>
      tpu.vector_store %arg7[%c0_21, %c0_22], %37 {strides = array<i32>} : memref<8x16xf32, #tpu.memory_space<vmem>>, vector<8x16xf32>,
    } else {
    }
    %c0 = arith.constant 0 : index
    %3 = memref.load %arg2[%c0] : memref<1xf32, #tpu.memory_space<smem>>
    %cst = arith.constant 0.000000e+00 : f32
    %4 = arith.subf %cst, %3 : f32
    %c0_1 = arith.constant 0 : index
    %5 = memref.load %arg3[%c0_1] : memref<1xf32, #tpu.memory_space<smem>>
    %cst_2 = arith.constant 0.000000e+00 : f32
    %6 = arith.subf %cst_2, %5 : f32
    %c0_3 = arith.constant 0 : index
    %c0_4 = arith.constant 0 : index
    %7 = vector.load %arg4[%c0_3, %c0_4] : memref<16x32xbf16, #tpu.memory_space<vmem>>, vector<16x32xbf16>
    %c0_5 = arith.constant 0 : index
    %c0_6 = arith.constant 0 : index
    %8 = vector.load %arg5[%c0_5, %c0_6] : memref<16x32xbf16, #tpu.memory_space<vmem>>, vector<16x32xbf16>
    %cst_7 = arith.constant dense<0.000000e+00> : vector<16x16xf32>
    %9 = tpu.matmul %7, %8, %cst_7 {dimension_numbers = #tpu.dot_dimension_numbers<[1], [1], [0], [0], [0, 0, 1, 0], [], []>} : vector<16x32xbf16>, vector<16x32xbf16>, vector<16x16xf32> -> vector<16x16xf32>
    %c16_i32 = arith.constant 16 : i32
    %10 = arith.muli %arg0, %c16_i32 : i32
    %c16_i32_8 = arith.constant 16 : i32
    %11 = arith.muli %arg1, %c16_i32_8 : i32
    %c16_i32_9 = arith.constant 16 : i32
    %12 = arith.addi %11, %c16_i32_9 : i32
    %13 = arith.cmpi slt, %10, %12 : i32
    %c16_i32_10 = arith.constant 16 : i32
    %14 = arith.addi %10, %c16_i32_10 : i32
    %15 = arith.cmpi slt, %11, %14 : i32
    %16 = arith.andi %13, %15 : i1
    %17 = arith.extui %16 : i1 to i32
    %c0_i32_11 = arith.constant 0 : i32
    %18 = arith.cmpi ne, %17, %c0_i32_11 : i32
    %19 = scf.if %18 -> (vector<16x16xf32>) {
      %37 = vector.broadcast %4 : f32 to vector<16x16xf32>
      %38 = arith.mulf %37, %9 : vector<16x16xf32>
      %39 = vector.broadcast %6 : f32 to vector<16x16xf32>
      %40 = arith.addf %38, %39 : vector<16x16xf32>
      %41 = tpu.iota {dimensions = array<i32: 0>} : vector<16x16xi32>
      %42 = vector.broadcast %10 : i32 to vector<16x16xi32>
      %43 = arith.addi %42, %41 : vector<16x16xi32>
      %44 = tpu.iota {dimensions = array<i32: 1>} : vector<16x16xi32>
      %45 = vector.broadcast %11 : i32 to vector<16x16xi32>
      %46 = arith.addi %45, %44 : vector<16x16xi32>
      %47 = arith.cmpi eq, %43, %46 : vector<16x16xi32>
      %cst_20 = arith.constant 0.000000e+00 : f32
      %48 = vector.broadcast %cst_20 : f32 to vector<16x16xf32>
      %49 = arith.subf %48, %40 : vector<16x16xf32>
      %50 = arith.select %47, %49, %40 : vector<16x16xi1>, vector<16x16xf32>
      scf.yield %50 : vector<16x16xf32>
    } else {
      %37 = vector.broadcast %4 : f32 to vector<16x16xf32>
      %38 = arith.mulf %37, %9 : vector<16x16xf32>
      %39 = vector.broadcast %6 : f32 to vector<16x16xf32>
      %40 = arith.addf %38, %39 : vector<16x16xf32>
      scf.yield %40 : vector<16x16xf32>
    }
    %cst_12 = arith.constant 0.000000e+00 : f32
    %20 = vector.broadcast %cst_12 : f32 to vector<16x16xf32>
    %21 = arith.minimumf %19, %20 : vector<16x16xf32>
    %22 = math.absf %19 : vector<16x16xf32>
    %cst_13 = arith.constant 0.000000e+00 : f32
    %23 = vector.broadcast %cst_13 : f32 to vector<16x16xf32>
    %24 = arith.subf %23, %22 : vector<16x16xf32>
    %25 = math.exp %24 : vector<16x16xf32>
    %26 = math.log1p %25 : vector<16x16xf32>
    %27 = arith.subf %21, %26 : vector<16x16xf32>
    %28 = vector.extract_strided_slice %27 {offsets = [0, 0], sizes = [8, 16], strides = [1, 1]} : vector<16x16xf32> to vector<8x16xf32>
    %29 = vector.extract_strided_slice %27 {offsets = [8, 0], sizes = [8, 16], strides = [1, 1]} : vector<16x16xf32> to vector<8x16xf32>
    %30 = arith.addf %28, %29 : vector<8x16xf32>
    %c0_14 = arith.constant 0 : index
    %c0_15 = arith.constant 0 : index
    %31 = vector.load %arg7[%c0_14, %c0_15] : memref<8x16xf32, #tpu.memory_space<vmem>>, vector<8x16xf32>
    %32 = arith.addf %31, %30 : vector<8x16xf32>
    %c0_16 = arith.constant 0 : index
    %c0_17 = arith.constant 0 : index
    %33 = vector.load %arg7[%c0_16, %c0_17] : memref<8x16xf32, #tpu.memory_space<vmem>>, vector<8x16xf32>
    tpu.vector_store %arg7[%c0_16, %c0_17], %32 {strides = array<i32>} : memref<8x16xf32, #tpu.memory_space<vmem>>, vector<8x16xf32>,
    %c0_i32_18 = arith.constant 0 : i32
    %34 = arith.cmpi eq, %arg1, %c0_i32_18 : i32
    %35 = arith.extui %34 : i1 to i32
    %c0_i32_19 = arith.constant 0 : i32
    %36 = arith.cmpi ne, %35, %c0_i32_19 : i32
    scf.if %36 {
      %c0_20 = arith.constant 0 : index
      %c0_21 = arith.constant 0 : index
      %37 = vector.load %arg7[%c0_20, %c0_21] : memref<8x16xf32, #tpu.memory_space<vmem>>, vector<8x16xf32>
      %c0_22 = arith.constant 0 : index
      %c0_23 = arith.constant 0 : index
      %38 = vector.load %arg6[%c0_22, %c0_23] : memref<8x16xf32, #tpu.memory_space<vmem>>, vector<8x16xf32>
      tpu.vector_store %arg6[%c0_22, %c0_23], %37 {strides = array<i32>} : memref<8x16xf32, #tpu.memory_space<vmem>>, vector<8x16xf32>,
    } else {
    }
    return
  }
  func.func @transform_0(%arg0: i32, %arg1: i32) -> i32 {
    %c0_i32 = arith.constant 0 : i32
    %c0_i32_0 = arith.constant 0 : i32
    return %c0_i32 : i32
  }
  func.func @transform_1(%arg0: i32, %arg1: i32) -> i32 {
    %c0_i32 = arith.constant 0 : i32
    %c0_i32_0 = arith.constant 0 : i32
    return %c0_i32 : i32
  }
  func.func @transform_2(%arg0: i32, %arg1: i32) -> (i32, i32) {
    %c0_i32 = arith.constant 0 : i32
    %c0_i32_0 = arith.constant 0 : i32
    return %arg0, %c0_i32 : i32, i32
  }
  func.func @transform_3(%arg0: i32, %arg1: i32) -> (i32, i32) {
    %c0_i32 = arith.constant 0 : i32
    %c0_i32_0 = arith.constant 0 : i32
    return %arg1, %c0_i32 : i32, i32
  }
  func.func @transform_4(%arg0: i32, %arg1: i32) -> (i32, i32) {
    %c0_i32 = arith.constant 0 : i32
    %c0_i32_0 = arith.constant 0 : i32
    return %arg0, %c0_i32 : i32, i32
  }
}

</mosaic_0001>

<bundles_post_ra>
// kernel: tpu_custom_call.1
= control target key start
LH: loop header
LB: loop body
LE: loop exit
PB: predicated region body
PF: predicated region fallthrough
CT: control target
= control target key end

     0   :  { %11 = vsyncpa [#allocation6], 0  ;;  %s349_s0 = inlined_call_operand.<no memory space> [shape: f32[1], index: 0, kind: input, shape index: {}]   ;;  %s350_s1 = inlined_call_operand.<no memory space> [shape: f32[1], index: 1, kind: input, shape index: {}]   ;;  %s351_s2 = inlined_call_operand.hbm [shape: bf16[16,32], index: 2, kind: input, shape index: {}]   ;;  %s352_s3 = inlined_call_operand.vmem [shape: bf16[16,32], index: 3, kind: input, shape index: {}]   ;;  %s353_s4 = inlined_call_operand.hbm [shape: f32[8,16], index: 4, kind: output, shape index: {}]  }
   0x1   :  { %12 = vsyncpa [#allocation7], 0  ;;  %s282_s15 = smov [#allocation5]   ;;  %s234_s19 = scalar_lea.hbm %s351_s2, 128 }
   0x2   :  { %s22_s16 = sshll.u32 %s282_s15, 4  ;;  %p235_p0 = scmp.ne.s32.totalorder %s351_s2, %s234_s19  ;;  %s23_s16 = int_to_ptr.vmem [resolvable:$true] %s22_s16 }
   0x3   :  { %p238_p1 = scmp.lt.u32.totalorder %s234_s19, %s351_s2 }
   0x5   :  { %p240_p2 = pnand %p238_p1, %p235_p0 }
   0x7   :  { %243 = shalt.err (!%p240_p2)
}
   0x8   :  { %s244_s24 = scalar_lea.vmem %s23_s16, 128  ;;  %p249_p4 = scmp.lt.s32.totalorder %s23_s16, %s23_s16 }
   0x9   :  { %p245_p3 = scmp.ne.s32.totalorder %s23_s16, %s244_s24  ;;  %p250_p5 = scmp.lt.s32.totalorder %s244_s24, %s244_s24 }
   0xb   :  { %p251_p6 = por %p250_p5, %p249_p4 }
   0xd   :  { %p252_p7 = pnand %p251_p6, %p245_p3 }
   0xf   :  { %255 = shalt.err (!%p252_p7)
}
  0x10   :  { %s283_s25 = smov 64   ;;  %s284_s26 = smov 4  }
  0x11   :  { %28 = dma.hbm_to_vmem [thread:$0]  %s351_s2, 128, %s23_s16, [#allocation6], %s283_s25, %s283_s25, %s284_s26  }
  0x12   :  { %278 = dma.done.wait [#allocation6], 128  }
  0x13   :  { %279 = vsyncadd [#allocation6], 4294967168  ;;  %vm39_vm0 = vcmask 130048   ;;  %v285_v0 = vmov 0.0   ;;  %vm286_vm1 = vmmov 0   ;;  %vm59_vm2 = vcmask 261120  }
  0x14   :  { %40 = vst.msk [vmem:[#allocation2] sm:$0xff] %vm39_vm0, %v285_v0  ;;  %212 = vmatprep.subr.bf16.mxu0 %v285_v0  ;;  %214 = vmatprep.mubr.msk.bf16.mxu0 %vm286_vm1, %v285_v0  ;;  %v224_v1 = vld [vmem:[%s352_s3] sm:$0xff]   ;;  %v225_v3 = vld [vmem:[#allocation5] sm:$0xff]   ;;  %s42_s6 = ssub.f32 0.0, %s349_s0  ;;  %v123_v4 = vlaneseq  ;;  %s287_s0 = smov [#allocation8]  }
  0x15   :  { %v64_v2 = vsel %vm59_vm2, %v224_v1, 0  ;;  %s44_s9 = ssub.f32 0.0, %s350_s1  ;;  %s198_s1 = sshll.u32 %s287_s0, 4  ;;  %s199_s1 = int_to_ptr.vmem [resolvable:$true] %s198_s1 }
  0x16   :  { %213 = vmatpush3.bf16.xpose.msra.mxu0 %v64_v2  ;;  %v117_v5 = vstv %s42_s6  ;;  %v124_v6 = vshrl.u32 %v123_v4, 7  ;;  %v130_v9 = vand.u32 127, %v123_v4  ;;  %s256_s3 = scalar_lea.vmem %s199_s1, 128  ;;  %p261_p9 = scmp.lt.s32.totalorder %s199_s1, %s199_s1 }
  0x17   :  { %v120_v8 = vstv %s44_s9  ;;  %p257_p8 = scmp.ne.s32.totalorder %s199_s1, %s256_s3  ;;  %p262_p10 = scmp.lt.s32.totalorder %s256_s3, %s256_s3 }
  0x18   :  { %v125_v13 = vadd.s32 8, %v124_v6  ;;  %vm133_vm3 = vcmp.eq.s32.totalorder %v124_v6, %v130_v9 }
  0x19   :  { %p263_p11 = por %p262_p10, %p261_p9 }
  0x1a   :  { %vm134_vm4 = vcmp.eq.s32.totalorder %v125_v13, %v130_v9 }
  0x1b   :  { %v183_v50 = vld [vmem:[#allocation2] sm:$0xff]  ;;  %p264_p12 = pnand %p263_p11, %p257_p8 }
  0x1d   :  { %215 = vmatmul.mubr.msk.bf16.vlgmr.msra.gmra.mrb[0].mxu0 %vm59_vm2, %v225_v3 }
  0xf0   :  { %v100_v7 = vpop.f32.mrb[0].mxu0 }
  0xf1   :  { %v118_v10 = vmul.f32 %v117_v5, %v100_v7  ;;  %v216_v11 = vpop.f32.mrb[1].mxu0 }
  0xf2   :  { %v103_v12 = vpop.f32.mrb[2].mxu0 }
  0xf3   :  { %v121_v14 = vadd.f32 %v120_v8, %v118_v10  ;;  %v119_v15 = vmul.f32 %v117_v5, %v103_v12  ;;  %v217_v16 = vpop.f32.mrb[3].mxu0 }
  0xf5   :  { %v135_v17 = vsub.f32 0.0, %v121_v14  ;;  %v122_v18 = vadd.f32 %v120_v8, %v119_v15 }
  0xf7   :  { %v137_v19 = vsel %vm133_vm3, %v135_v17, %v121_v14  ;;  %v136_v20 = vsub.f32 0.0, %v122_v18 }
  0xf8   :  { %v154_v21 = vand.u32 2147483647, %v137_v19  ;;  %v152_v45 = vmin.f32 %v137_v19, 0.0 }
  0xf9   :  { %v138_v22 = vsel %vm134_vm4, %v136_v20, %v122_v18 }
  0xfa   :  { %v156_v23 = vsub.f32 0.0, %v154_v21  ;;  %v155_v24 = vand.u32 2147483647, %v138_v22  ;;  %v153_v46 = vmin.f32 %v138_v22, 0.0 }
  0xfc   :  { %v158_v25 = vmul.f32 1.442695, %v156_v23  ;;  %v157_v26 = vsub.f32 0.0, %v155_v24 }
  0xfe   :  { %226 = vpow2.f32 %v158_v25  ;;  %v160_v27 = vmul.f32 1.442695, %v157_v26 }
 0x100   :  { %228 = vpow2.f32 %v160_v27 }
 0x108   :  { %v227_v28 = vpop.eup %226 }
 0x109   :  { %v162_v29 = vadd.f32 1.0, %v227_v28  ;;  %v165_v32 = vmul.f32 -0.5, %v227_v28  ;;  %v168_v35 = vand.u32 2147483647, %v227_v28 }
 0x10a   :  { %v229_v30 = vpop.eup %228 }
 0x10b   :  { %230 = vlog2.f32 %v162_v29  ;;  %v171_v31 = vadd.f32 1.0, %v229_v30  ;;  %v174_v33 = vmul.f32 -0.5, %v229_v30  ;;  %v166_v34 = vadd.f32 1.0, %v165_v32 }
 0x10c   :  { %v177_v38 = vand.u32 2147483647, %v229_v30  ;;  %vm169_vm5 = vcmp.lt.f32.partialorder %v168_v35, 0.0004427343 }
 0x10d   :  { %232 = vlog2.f32 %v171_v31  ;;  %v175_v36 = vadd.f32 1.0, %v174_v33  ;;  %v167_v40 = vmul.f32 %v227_v28, %v166_v34 }
 0x10e   :  { %vm178_vm6 = vcmp.lt.f32.partialorder %v177_v38, 0.0004427343 }
 0x10f   :  { %v176_v44 = vmul.f32 %v229_v30, %v175_v36 }
 0x115   :  { %v231_v37 = vpop.eup %230 }
 0x116   :  { %v164_v39 = vmul.f32 0.6931472, %v231_v37 }
 0x117   :  { %v233_v41 = vpop.eup %232 }
 0x118   :  { %v170_v42 = vsel %vm169_vm5, %v167_v40, %v164_v39  ;;  %v173_v43 = vmul.f32 0.6931472, %v233_v41 }
 0x119   :  { %v180_v48 = vsub.f32 %v152_v45, %v170_v42 }
 0x11a   :  { %v179_v47 = vsel %vm178_vm6, %v176_v44, %v173_v43 }
 0x11b   :  { %v181_v49 = vsub.f32 %v153_v46, %v179_v47 }
 0x11d   :  { %v182_v51 = vadd.f32 %v181_v49, %v180_v48 }
 0x11f   :  { %v184_v52 = vadd.f32 %v183_v50, %v182_v51 }
 0x121   :  { %186 = vst.msk [vmem:[#allocation2] sm:$0xff] %vm39_vm0, %v184_v52 }
 0x128   :  { %v190_v53 = vld [vmem:[#allocation2] sm:$0xff] }
 0x129   :  { %191 = vst.msk [vmem:[#allocation8] sm:$0xff] %vm39_vm0, %v190_v53 }
 0x12a   :  { %267 = shalt.err (!%p264_p12)
}
 0x12b   :  { %s268_s12 = scalar_lea.hbm %s353_s4, 128 }
 0x12c   :  { %p269_p13 = scmp.ne.s32.totalorder %s353_s4, %s268_s12  ;;  %p272_p0 = scmp.lt.u32.totalorder %s268_s12, %s353_s4 }
 0x12e   :  { %p274_p1 = pnand %p272_p0, %p269_p13 }
 0x130   :  { %277 = shalt.err (!%p274_p1)
}
 0x131   :  { %201 = dma.vmem_to_hbm [thread:$0]  %s199_s1, 128, %s353_s4, [#allocation7]  }
 0x132   :  { %280 = dma.done.wait [#allocation7], 128  }
 0x133   :  { %281 = vsyncadd [#allocation7], 4294967168 }
 0x134   :  { %205 = vsyncpa [#allocation6], 1 }
 0x135   :  { %206 = vsyncpa [#allocation7], 1 }

</bundles_post_ra>
